<compile_context>
chip_gen: v7x
topology: tpu7x:2x2x1
jax: 0.10.0
libtpu: 0.0.40
codegen_flags: <defaults>
</compile_context>

<pallas_src>
import functools
import math

import jax
import jax.numpy as jnp
from jax.experimental import pallas as pl
from jax.experimental.pallas import tpu as pltpu


def _round_up(x, m):
    return (x + m - 1) // m * m


def _cdiv(a, b):
    return (a + b - 1) // b


def _make_arcface_kernel(scaling: float, gamma: float, tile_c: int, num_classes: int):
    def kernel(cos_ref, lab_ref, tsc_ref, out_ref, m_ref, l_ref):
        c = pl.program_id(1)
        nc = pl.num_programs(1)

        @pl.when(c == 0)
        def _init():
            m_ref[...] = jnp.full_like(m_ref, -1e37)   # running row max
            l_ref[...] = jnp.zeros_like(l_ref)         # running exp-sum

        x = cos_ref[...].astype(jnp.float32) * scaling          # (TB, TC) f32
        tb, tc = x.shape
        lab_rel = lab_ref[...] - c * tile_c                     # (TB, 1) int32
        t_sc = tsc_ref[...]                                     # (TB, 1) scaled transformed
        iota = jax.lax.broadcasted_iota(jnp.int32, (tb, tc), 1)
        onehot = iota == lab_rel                                # (TB, TC) bool

        def fold(logits):
            # fused scatter + online-softmax fold (single pass over tile)
            m_prev = m_ref[...]
            m_new = jnp.maximum(m_prev, jnp.max(logits, axis=-1, keepdims=True))
            alpha = jnp.exp(m_prev - m_new)
            l_ref[...] = alpha * l_ref[...] + jnp.sum(
                jnp.exp(logits - m_new), axis=-1, keepdims=True)
            m_ref[...] = m_new

        @pl.when(c < nc - 1)
        def _interior():
            # interior class tiles: no lane masking needed
            fold(jnp.where(onehot, t_sc, x))

        @pl.when(c == nc - 1)
        def _edge_and_finalize():
            # ragged last class tile: mask lanes beyond num_classes (padded /
            # unspecified edge-block lanes fall out of max & exp-sum; one-hot
            # can never match them since labels < num_classes).
            lanes_left = num_classes - c * tile_c
            valid = iota < lanes_left
            fold(jnp.where(onehot, t_sc, jnp.where(valid, x, -1e30)))

            # cross-entropy (reduction='none'): lse(row) - scaled target logit
            ce = (m_ref[...] + jnp.log(l_ref[...])) - t_sc       # (TB, 1)
            one_minus_p = 1.0 - jnp.exp(-ce)
            if gamma == 1.0:                       # default path: no power op
                w = one_minus_p
            elif float(gamma).is_integer() and 1.0 < gamma <= 4.0:
                w = one_minus_p                    # small int gamma: repeated mul
                for _ in range(int(gamma) - 1):
                    w = w * one_minus_p
            else:
                w = one_minus_p ** gamma
            out_ref[...] = (w * ce).astype(out_ref.dtype)

    return kernel


@functools.partial(jax.jit, static_argnames=("scaling", "margin", "gamma"))
def arcface_loss(cosine, label, *, scaling=30.0, margin=0.5, gamma=1.0):
    B, C = cosine.shape
    cos_m = math.cos(margin)
    sin_m = math.sin(margin)
    mono_thresh = -math.cos(margin)
    mono_values = math.sin(margin) * margin

    # Hoisted target gather + ArcFace margin transform (touches only B elems;
    # the streamed kernel never re-derives it per class tile).
    # cos(acos(t) + m) == t*cos(m) - sin(m)*sqrt(1 - t^2)   (exact identity)
    # TODO(synk): out-of-range labels are clamped by the XLA gather instead of erroring.
    t = jnp.clip(cosine[jnp.arange(B), label].astype(jnp.float32), -1.0, 1.0)
    t_trans = t * cos_m - sin_m * jnp.sqrt(jnp.maximum(1.0 - t * t, 0.0))
    t_trans = jnp.where(t > mono_thresh, t_trans, t - mono_values)
    t_scaled = (t_trans * scaling).reshape(B, 1).astype(jnp.float32)

    lab = label.astype(jnp.int32).reshape(B, 1)

    # Class tiling: lane-dense tiles (multiples of 128); ragged last tile is
    # masked in-kernel — no wrapper-side jnp.pad / extra HBM pass.
    if C <= 2048:
        tile_c = _round_up(C, 128)
    else:
        tile_c = 1024
    grid_c = _cdiv(C, tile_c)

    # Batch tiling: >=2 "parallel" blocks whenever B allows (keeps both v7x
    # TensorCores busy); bf16 rounds sublanes to 16, f32 to 8.  Ragged batch
    # is handled by Pallas edge blocks (per-row math, rows >= B never written).
    sub = 16 if cosine.dtype == jnp.bfloat16 else 8
    if B < 2 * sub:
        tile_b = B                                   # full-dim exemption
    else:
        tile_b = min(128, _round_up(_cdiv(B, 2), sub))
    grid_b = _cdiv(B, tile_b)

    kernel = _make_arcface_kernel(float(scaling), float(gamma), tile_c, C)

    # VMEM budget sized from the f32 working set (double-buffered input tile
    # plus a few full-tile f32 temporaries from the cast/scale/exp chain),
    # capped well under v7x's 64 MiB physical VMEM.
    in_bytes = tile_b * tile_c * cosine.dtype.itemsize
    f32_tile_bytes = tile_b * tile_c * 4
    vmem_limit = int(min(48 * 2**20,
                         max(16 * 2**20, 2 * in_bytes + 6 * f32_tile_bytes)))

    per_row = pl.pallas_call(
        kernel,
        out_shape=jax.ShapeDtypeStruct((B, 1), jnp.float32),
        grid_spec=pltpu.PrefetchScalarGridSpec(
            num_scalar_prefetch=0,
            grid=(grid_b, grid_c),
            in_specs=[
                # NOTE: on v5e, if profiling still shows exposed DMA with these
                # larger tiles, bump this spec to pipeline_mode=pl.Buffered(3).
                pl.BlockSpec((tile_b, tile_c), lambda b, c: (b, c)),
                pl.BlockSpec((tile_b, 1), lambda b, c: (b, 0)),  # labels: resident over C
                pl.BlockSpec((tile_b, 1), lambda b, c: (b, 0)),  # scaled transformed target
            ],
            out_specs=pl.BlockSpec((tile_b, 1), lambda b, c: (b, 0)),
            scratch_shapes=[
                pltpu.VMEM((tile_b, 1), jnp.float32),   # running max
                pltpu.VMEM((tile_b, 1), jnp.float32),   # running exp-sum
            ],
        ),
        compiler_params=pltpu.CompilerParams(
            dimension_semantics=("parallel", "arbitrary"),
            vmem_limit_bytes=vmem_limit,
        ),
    )(cosine, lab, t_scaled)

    # mean over the real batch rows (output has exactly B rows)
    return jnp.mean(per_row[:, 0])


def _reference(cosine, label, *, scaling=30.0, margin=0.5, gamma=1.0):
    # pure-JAX reference mirroring the PyTorch code (uses real acos/cos)
    cosine = cosine.astype(jnp.float32)
    B = cosine.shape[0]
    thresh = -math.cos(margin)
    mm = math.sin(margin) * margin
    target = cosine[jnp.arange(B), label]
    transformed = jnp.cos(jnp.arccos(jnp.clip(target, -1.0, 1.0)) + margin)
    transformed = jnp.where(target > thresh, transformed, target - mm)
    logits = cosine.at[jnp.arange(B), label].set(transformed) * scaling
    logp = jax.nn.log_softmax(logits, axis=-1)
    ce = -logp[jnp.arange(B), label]
    p = jnp.exp(-ce)
    return jnp.mean(((1.0 - p) ** gamma) * ce)


if __name__ == "__main__":
    key = jax.random.PRNGKey(0)
    k1, k2, k3, k4, k5, k6 = jax.random.split(key, 6)

    scaling, margin = 30.0, 0.5   # deterministic "module init" params

    # Case 1: tiny class count (single 128-lane tile, 96 masked edge lanes).
    B1, C1 = 8, 32
    cos1 = jnp.tanh(jax.random.normal(k1, (B1, C1), dtype=jnp.float32))
    lab1 = jax.random.randint(k2, (B1,), 0, C1, dtype=jnp.int32)
    out1 = arcface_loss(cos1, lab1, scaling=scaling, margin=margin)
    jax.block_until_ready(out1)
    ref1 = _reference(cos1, lab1, scaling=scaling, margin=margin)
    assert jnp.allclose(out1, ref1, atol=1e-4, rtol=1e-4), (out1, ref1)

    # Case 2: streamed multi-tile C (3 tiles of 1024, ragged last tile) plus a
    # ragged batch split into 2 parallel blocks (edge batch block, no pad).
    B2, C2 = 20, 2500
    cos2 = jnp.tanh(jax.random.normal(k3, (B2, C2), dtype=jnp.float32))
    lab2 = jax.random.randint(k4, (B2,), 0, C2, dtype=jnp.int32)
    out2 = arcface_loss(cos2, lab2, scaling=scaling, margin=margin)
    jax.block_until_ready(out2)
    ref2 = _reference(cos2, lab2, scaling=scaling, margin=margin)
    assert jnp.allclose(out2, ref2, atol=1e-4, rtol=1e-4), (out2, ref2)

    # Case 3: bf16 HBM-side cosine (kernel computes in f32, 16-sublane rows).
    B3, C3 = 16, 300
    cos3 = jnp.tanh(jax.random.normal(k5, (B3, C3), dtype=jnp.float32)).astype(jnp.bfloat16)
    lab3 = jax.random.randint(k6, (B3,), 0, C3, dtype=jnp.int32)
    out3 = arcface_loss(cos3, lab3, scaling=scaling, margin=margin)
    jax.block_until_ready(out3)
    ref3 = _reference(cos3.astype(jnp.float32), lab3,
                      scaling=scaling, margin=margin)
    assert jnp.allclose(out3, ref3, atol=1e-3, rtol=1e-3), (out3, ref3)

    print("KERNEL_OK")
</pallas_src>

<mosaic_0001>
module attributes {stable_mosaic.version = 11 : i64} {
  func.func @kernel(%arg0: i32, %arg1: i32, %arg2: memref<8x128xf32, #tpu.memory_space<vmem>>, %arg3: memref<8x1xi32, #tpu.memory_space<vmem>>, %arg4: memref<8x1xf32, #tpu.memory_space<vmem>>, %arg5: memref<8x1xf32, #tpu.memory_space<vmem>>, %arg6: memref<8x1xf32, #tpu.memory_space<vmem>>, %arg7: memref<8x1xf32, #tpu.memory_space<vmem>>) attributes {dimension_semantics = [#tpu.dimension_semantics<parallel>, #tpu.dimension_semantics<arbitrary>], iteration_bounds = array<i64: 1, 1>, scalar_prefetch = 0 : i64, scratch_operands = 2 : i64, tpu.core_type = #tpu.core_type<tc>, window_params = [{transform_indices = @transform_0, window_bounds = array<i64: 8, 128>}, {transform_indices = @transform_1, window_bounds = array<i64: 8, 1>}, {transform_indices = @transform_2, window_bounds = array<i64: 8, 1>}, {transform_indices = @transform_3, window_bounds = array<i64: 8, 1>}]} {
    %c0_i32 = arith.constant 0 : i32
    %0 = arith.cmpi eq, %arg1, %c0_i32 : i32
    %1 = arith.extui %0 : i1 to i32
    %c0_i32_0 = arith.constant 0 : i32
    %2 = arith.cmpi ne, %1, %c0_i32_0 : i32
    scf.if %2 {
      %cst_10 = arith.constant -9.99999993E+36 : f32
      %20 = vector.broadcast %cst_10 : f32 to vector<8x1xf32>
      %c0_11 = arith.constant 0 : index
      %c0_12 = arith.constant 0 : index
      %21 = vector.load %arg6[%c0_11, %c0_12] : memref<8x1xf32, #tpu.memory_space<vmem>>, vector<8x1xf32>
      tpu.vector_store %arg6[%c0_11, %c0_12], %20 {strides = array<i32>} : memref<8x1xf32, #tpu.memory_space<vmem>>, vector<8x1xf32>,
      %cst_13 = arith.constant 0.000000e+00 : f32
      %22 = vector.broadcast %cst_13 : f32 to vector<8x1xf32>
      %c0_14 = arith.constant 0 : index
      %c0_15 = arith.constant 0 : index
      %23 = vector.load %arg7[%c0_14, %c0_15] : memref<8x1xf32, #tpu.memory_space<vmem>>, vector<8x1xf32>
      tpu.vector_store %arg7[%c0_14, %c0_15], %22 {strides = array<i32>} : memref<8x1xf32, #tpu.memory_space<vmem>>, vector<8x1xf32>,
    } else {
    }
    %c0 = arith.constant 0 : index
    %c0_1 = arith.constant 0 : index
    %3 = vector.load %arg2[%c0, %c0_1] : memref<8x128xf32, #tpu.memory_space<vmem>>, vector<8x128xf32>
    %cst = arith.constant 3.000000e+01 : f32
    %4 = vector.broadcast %cst : f32 to vector<8x128xf32>
    %5 = arith.mulf %3, %4 : vector<8x128xf32>
    %c0_2 = arith.constant 0 : index
    %c0_3 = arith.constant 0 : index
    %6 = vector.load %arg3[%c0_2, %c0_3] : memref<8x1xi32, #tpu.memory_space<vmem>>, vector<8x1xi32>
    %c128_i32 = arith.constant 128 : i32
    %7 = arith.muli %arg1, %c128_i32 : i32
    %8 = vector.broadcast %7 : i32 to vector<8x1xi32>
    %9 = arith.subi %6, %8 : vector<8x1xi32>
    %c0_4 = arith.constant 0 : index
    %c0_5 = arith.constant 0 : index
    %10 = vector.load %arg4[%c0_4, %c0_5] : memref<8x1xf32, #tpu.memory_space<vmem>>, vector<8x1xf32>
    %11 = tpu.iota {dimensions = array<i32: 1>} : vector<8x128xi32>
    %12 = vector.broadcast %9 : vector<8x1xi32> to vector<8x128xi32>
    %13 = arith.cmpi eq, %11, %12 : vector<8x128xi32>
    %c0_i32_6 = arith.constant 0 : i32
    %14 = arith.cmpi slt, %arg1, %c0_i32_6 : i32
    %15 = arith.extui %14 : i1 to i32
    %c0_i32_7 = arith.constant 0 : i32
    %16 = arith.cmpi ne, %15, %c0_i32_7 : i32
    scf.if %16 {
      %20 = vector.shape_cast %10 : vector<8x1xf32> to vector<8x1xf32>
      %21 = vector.broadcast %20 : vector<8x1xf32> to vector<8x128xf32>
      %22 = arith.select %13, %21, %5 : vector<8x128xi1>, vector<8x128xf32>
      %c0_10 = arith.constant 0 : index
      %c0_11 = arith.constant 0 : index
      %23 = vector.load %arg6[%c0_10, %c0_11] : memref<8x1xf32, #tpu.memory_space<vmem>>, vector<8x1xf32>
      %cst_12 = arith.constant dense<0xFF800000> : vector<8xf32>
      %24 = vector.multi_reduction <maximumf>, %22, %cst_12 [1] : vector<8x128xf32> to vector<8xf32>
      %25 = vector.shape_cast %24 : vector<8xf32> to vector<8x1xf32>
      %26 = arith.maximumf %23, %25 : vector<8x1xf32>
      %27 = arith.subf %23, %26 : vector<8x1xf32>
      %28 = math.exp %27 : vector<8x1xf32>
      %c0_13 = arith.constant 0 : index
      %c0_14 = arith.constant 0 : index
      %29 = vector.load %arg7[%c0_13, %c0_14] : memref<8x1xf32, #tpu.memory_space<vmem>>, vector<8x1xf32>
      %30 = arith.mulf %28, %29 : vector<8x1xf32>
      %31 = vector.broadcast %26 : vector<8x1xf32> to vector<8x128xf32>
      %32 = arith.subf %22, %31 : vector<8x128xf32>
      %33 = math.exp %32 : vector<8x128xf32>
      %cst_15 = arith.constant dense<0.000000e+00> : vector<8xf32>
      %34 = vector.multi_reduction <add>, %33, %cst_15 [1] : vector<8x128xf32> to vector<8xf32>
      %35 = vector.shape_cast %34 : vector<8xf32> to vector<8x1xf32>
      %36 = arith.addf %30, %35 : vector<8x1xf32>
      %c0_16 = arith.constant 0 : index
      %c0_17 = arith.constant 0 : index
      %37 = vector.load %arg7[%c0_16, %c0_17] : memref<8x1xf32, #tpu.memory_space<vmem>>, vector<8x1xf32>
      tpu.vector_store %arg7[%c0_16, %c0_17], %36 {strides = array<i32>} : memref<8x1xf32, #tpu.memory_space<vmem>>, vector<8x1xf32>,
      %c0_18 = arith.constant 0 : index
      %c0_19 = arith.constant 0 : index
      %38 = vector.load %arg6[%c0_18, %c0_19] : memref<8x1xf32, #tpu.memory_space<vmem>>, vector<8x1xf32>
      tpu.vector_store %arg6[%c0_18, %c0_19], %26 {strides = array<i32>} : memref<8x1xf32, #tpu.memory_space<vmem>>, vector<8x1xf32>,
    } else {
    }
    %c0_i32_8 = arith.constant 0 : i32
    %17 = arith.cmpi eq, %arg1, %c0_i32_8 : i32
    %18 = arith.extui %17 : i1 to i32
    %c0_i32_9 = arith.constant 0 : i32
    %19 = arith.cmpi ne, %18, %c0_i32_9 : i32
    scf.if %19 {
      %c128_i32_10 = arith.constant 128 : i32
      %20 = arith.muli %arg1, %c128_i32_10 : i32
      %c32_i32 = arith.constant 32 : i32
      %21 = arith.subi %c32_i32, %20 : i32
      %22 = vector.broadcast %21 : i32 to vector<8x128xi32>
      %23 = arith.cmpi slt, %11, %22 : vector<8x128xi32>
      %cst_11 = arith.constant -1.000000e+30 : f32
      %24 = vector.broadcast %cst_11 : f32 to vector<8x128xf32>
      %25 = arith.select %23, %5, %24 : vector<8x128xi1>, vector<8x128xf32>
      %26 = vector.shape_cast %10 : vector<8x1xf32> to vector<8x1xf32>
      %27 = vector.broadcast %26 : vector<8x1xf32> to vector<8x128xf32>
      %28 = arith.select %13, %27, %25 : vector<8x128xi1>, vector<8x128xf32>
      %c0_12 = arith.constant 0 : index
      %c0_13 = arith.constant 0 : index
      %29 = vector.load %arg6[%c0_12, %c0_13] : memref<8x1xf32, #tpu.memory_space<vmem>>, vector<8x1xf32>
      %cst_14 = arith.constant dense<0xFF800000> : vector<8xf32>
      %30 = vector.multi_reduction <maximumf>, %28, %cst_14 [1] : vector<8x128xf32> to vector<8xf32>
      %31 = vector.shape_cast %30 : vector<8xf32> to vector<8x1xf32>
      %32 = arith.maximumf %29, %31 : vector<8x1xf32>
      %33 = arith.subf %29, %32 : vector<8x1xf32>
      %34 = math.exp %33 : vector<8x1xf32>
      %c0_15 = arith.constant 0 : index
      %c0_16 = arith.constant 0 : index
      %35 = vector.load %arg7[%c0_15, %c0_16] : memref<8x1xf32, #tpu.memory_space<vmem>>, vector<8x1xf32>
      %36 = arith.mulf %34, %35 : vector<8x1xf32>
      %37 = vector.broadcast %32 : vector<8x1xf32> to vector<8x128xf32>
      %38 = arith.subf %28, %37 : vector<8x128xf32>
      %39 = math.exp %38 : vector<8x128xf32>
      %cst_17 = arith.constant dense<0.000000e+00> : vector<8xf32>
      %40 = vector.multi_reduction <add>, %39, %cst_17 [1] : vector<8x128xf32> to vector<8xf32>
      %41 = vector.shape_cast %40 : vector<8xf32> to vector<8x1xf32>
      %42 = arith.addf %36, %41 : vector<8x1xf32>
      %c0_18 = arith.constant 0 : index
      %c0_19 = arith.constant 0 : index
      %43 = vector.load %arg7[%c0_18, %c0_19] : memref<8x1xf32, #tpu.memory_space<vmem>>, vector<8x1xf32>
      tpu.vector_store %arg7[%c0_18, %c0_19], %42 {strides = array<i32>} : memref<8x1xf32, #tpu.memory_space<vmem>>, vector<8x1xf32>,
      %c0_20 = arith.constant 0 : index
      %c0_21 = arith.constant 0 : index
      %44 = vector.load %arg6[%c0_20, %c0_21] : memref<8x1xf32, #tpu.memory_space<vmem>>, vector<8x1xf32>
      tpu.vector_store %arg6[%c0_20, %c0_21], %32 {strides = array<i32>} : memref<8x1xf32, #tpu.memory_space<vmem>>, vector<8x1xf32>,
      %c0_22 = arith.constant 0 : index
      %c0_23 = arith.constant 0 : index
      %45 = vector.load %arg6[%c0_22, %c0_23] : memref<8x1xf32, #tpu.memory_space<vmem>>, vector<8x1xf32>
      %c0_24 = arith.constant 0 : index
      %c0_25 = arith.constant 0 : index
      %46 = vector.load %arg7[%c0_24, %c0_25] : memref<8x1xf32, #tpu.memory_space<vmem>>, vector<8x1xf32>
      %47 = math.log %46 : vector<8x1xf32>
      %48 = arith.addf %45, %47 : vector<8x1xf32>
      %49 = arith.subf %48, %10 : vector<8x1xf32>
      %cst_26 = arith.constant 0.000000e+00 : f32
      %50 = vector.broadcast %cst_26 : f32 to vector<8x1xf32>
      %51 = arith.subf %50, %49 : vector<8x1xf32>
      %52 = math.exp %51 : vector<8x1xf32>
      %cst_27 = arith.constant 1.000000e+00 : f32
      %53 = vector.broadcast %cst_27 : f32 to vector<8x1xf32>
      %54 = arith.subf %53, %52 : vector<8x1xf32>
      %55 = arith.mulf %54, %49 : vector<8x1xf32>
      %c0_28 = arith.constant 0 : index
      %c0_29 = arith.constant 0 : index
      %56 = vector.load %arg5[%c0_28, %c0_29] : memref<8x1xf32, #tpu.memory_space<vmem>>, vector<8x1xf32>
      tpu.vector_store %arg5[%c0_28, %c0_29], %55 {strides = array<i32>} : memref<8x1xf32, #tpu.memory_space<vmem>>, vector<8x1xf32>,
    } else {
    }
    return
  }
  func.func @transform_0(%arg0: i32, %arg1: i32) -> (i32, i32) {
    %c0_i32 = arith.constant 0 : i32
    return %arg0, %arg1 : i32, i32
  }
  func.func @transform_1(%arg0: i32, %arg1: i32) -> (i32, i32) {
    %c0_i32 = arith.constant 0 : i32
    %c0_i32_0 = arith.constant 0 : i32
    return %arg0, %c0_i32 : i32, i32
  }
  func.func @transform_2(%arg0: i32, %arg1: i32) -> (i32, i32) {
    %c0_i32 = arith.constant 0 : i32
    %c0_i32_0 = arith.constant 0 : i32
    return %arg0, %c0_i32 : i32, i32
  }
  func.func @transform_3(%arg0: i32, %arg1: i32) -> (i32, i32) {
    %c0_i32 = arith.constant 0 : i32
    %c0_i32_0 = arith.constant 0 : i32
    return %arg0, %c0_i32 : i32, i32
  }
}

</mosaic_0001>

<bundles_post_ra>
// kernel: arcface_loss.1
= control target key start
LH: loop header
LB: loop body
LE: loop exit
PB: predicated region body
PF: predicated region fallthrough
CT: control target
= control target key end

     0   :  { %v132_v0 = vmov 0   ;;  %vm18_vm0 = vcmask 7168   ;;  %v133_v3 = vmov -1e+37   ;;  %v28_v4 = vlaneseq  ;;  %s172_s1 = inlined_call_operand.vmem [shape: s32[8,1], index: 1, kind: input, shape index: {}]   ;;  %s173_s2 = inlined_call_operand.vmem [shape: f32[8,1], index: 2, kind: input, shape index: {}]   ;;  %s174_s0 = inlined_call_operand.vmem [shape: f32[8,32], index: 0, kind: input, shape index: {}]   ;;  %s175_s3 = inlined_call_operand.vmem [shape: f32[8,1], index: 3, kind: output, shape index: {}]  }
   0x1   :  { %122 = vset.pattern.permute.xlu0 %v132_v0  ;;  %v23_v1 = vld [vmem:[%s172_s1] sm:$0xff]  ;;  %123 = vset.pattern.permute.xlu1 %v132_v0  ;;  %19 = vst.msk [vmem:[#allocation2] sm:$0xff] %vm18_vm0, %v133_v3  ;;  %v134_v12 = vmov 0.0  }
   0x2   :  { %31 = vperm.xlu0 %122, %v23_v1   ;;  %v27_v2 = vld [vmem:[%s173_s2] sm:$0xff]  ;;  %v29_v6 = vand.u32 127, %v28_v4  ;;  %20 = vst.msk [vmem:[#allocation3] sm:$0xff] %vm18_vm0, %v134_v12 }
   0x3   :  { %v21_v5 = vld [vmem:[%s174_s0] sm:$0xff] }
   0x4   :  { %v22_v7 = vmul.f32 30.0, %v21_v5  ;;  %vm72_vm1 = vcmp.lt.s32.totalorder %v29_v6, 32 }
   0x6   :  { %76 = vperm.xlu0 %122, %v27_v2   ;;  %v73_v9 = vsel %vm72_vm1, %v22_v7, -1e+30 }
   0x8   :  { %v80_v13 = vld [vmem:[#allocation2] sm:$0xff] }
   0x9   :  { %v87_v23 = vld [vmem:[#allocation3] sm:$0xff] }
  0x81   :  { %v32_v8 = vpop.permute.xlu0 %31 }
  0x82   :  { %vm33_vm2 = vcmp.eq.s32.totalorder %v29_v6, %v32_v8 }
  0x85   :  { %v77_v10 = vpop.permute.xlu0 %76 }
  0x86   :  { %v79_v11 = vsel %vm33_vm2, %v77_v10, %v73_v9 }
  0x87   :  { %81 = vmax.xlane.f32.xlu1 %v79_v11 }
 0x114   :  { %v82_v14 = vpop.xlane.xlu1 %81 }
 0x115   :  { %v83_v15 = vmax.f32 %v80_v13, %v82_v14 }
 0x117   :  { %v84_v16 = vsub.f32 %v80_v13, %v83_v15  ;;  %102 = vst.msk [vmem:[#allocation2] sm:$0xff] %vm18_vm0, %v83_v15  ;;  %91 = vperm.xlu1 %123, %v83_v15  }
 0x119   :  { %v85_v21 = vmul.f32 1.442695, %v84_v16 }
 0x11e   :  { %v103_v30 = vld [vmem:[#allocation2] sm:$0xff] }
 0x196   :  { %v92_v17 = vpop.permute.xlu1 %91 }
 0x197   :  { %v94_v18 = vsub.f32 %v79_v11, %v92_v17 }
 0x199   :  { %v95_v19 = vmul.f32 1.442695, %v94_v18 }
 0x19b   :  { %124 = vpow2.f32 %v95_v19 }
 0x19c   :  { %126 = vpow2.f32 %v85_v21 }
 0x1a5   :  { %v125_v20 = vpop.eup %124 }
 0x1a6   :  { %97 = vadd.xlane.f32.xlu0 %v125_v20  ;;  %v127_v22 = vpop.eup %126 }
 0x1a7   :  { %v88_v24 = vmul.f32 %v127_v22, %v87_v23 }
 0x233   :  { %v98_v25 = vpop.xlane.xlu0 %97 }
 0x234   :  { %v99_v26 = vadd.f32 %v98_v25, %v88_v24 }
 0x236   :  { %101 = vst.msk [vmem:[#allocation3] sm:$0xff] %vm18_vm0, %v99_v26 }
 0x23d   :  { %v104_v27 = vld [vmem:[#allocation3] sm:$0xff] }
 0x23e   :  { %128 = vlog2.f32 %v104_v27 }
 0x248   :  { %v129_v28 = vpop.eup %128 }
 0x249   :  { %v106_v29 = vmul.f32 0.6931472, %v129_v28 }
 0x24b   :  { %v107_v31 = vadd.f32 %v106_v29, %v103_v30 }
 0x24d   :  { %v108_v32 = vsub.f32 %v107_v31, %v27_v2 }
 0x24f   :  { %v109_v33 = vsub.f32 0.0, %v108_v32 }
 0x251   :  { %v110_v34 = vmul.f32 1.442695, %v109_v33 }
 0x253   :  { %130 = vpow2.f32 %v110_v34 }
 0x25d   :  { %v131_v35 = vpop.eup %130 }
 0x25e   :  { %v112_v36 = vsub.f32 1.0, %v131_v35 }
 0x260   :  { %v113_v37 = vmul.f32 %v112_v36, %v108_v32 }
 0x262   :  { %114 = vst.msk [vmem:[%s175_s3] sm:$0xff] %vm18_vm0, %v113_v37 }

</bundles_post_ra>
